<compile_context>
chip_gen: v7x
topology: tpu7x:2x2x1
jax: 0.10.0
libtpu: 0.0.40
codegen_flags: <defaults>
</compile_context>

<pallas_src>
import jax
import jax.numpy as jnp
from jax.experimental import pallas as pl
from jax.experimental.pallas import tpu as pltpu


def _pq_kernel(pt_ref, qt_ref, a_ref, x_ref, o_ref):
    # pt_ref = P.T, qt_ref = Q.T : (d, d)
    # a_ref: (TB, d, d); x_ref / o_ref: (TB, 1, d)
    x = x_ref[:, 0, :]                                               # (TB, d)
    # qx[b] = Q @ x[b]  -- one (TB, d) @ (d, d) MXU matmul for the whole tile.
    qx = jnp.dot(x, qt_ref[...], preferred_element_type=jnp.float32)  # (TB, d)
    # ax[b] = A[b] @ qx[b] -- memory-bound batched mat-vec (VPU mul + lane reduce).
    ax = jnp.sum(a_ref[...] * qx[:, None, :], axis=-1)               # (TB, d)
    # out[b] = P @ ax[b]
    out = jnp.dot(ax, pt_ref[...], preferred_element_type=jnp.float32)
    o_ref[...] = out[:, None, :].astype(o_ref.dtype)


def _plan_tiles(B, d, itemsize):
    """Pick batch-tile size TB and a VMEM limit for this TPU generation."""
    try:
        vmem_cap = pltpu.get_tpu_info().vmem_capacity_bytes
    except Exception:
        vmem_cap = 64 << 20  # v7x per-core physical VMEM = smallest generation
    vmem_limit = int(vmem_cap * 0.8)

    # A tile in VMEM is lane/sublane padded: last dim -> x128, 2nd-last -> x8.
    d_lane = -(-d // 128) * 128
    d_sub = -(-d // 8) * 8
    a_bytes_per_elem = d_sub * d_lane * itemsize

    # Double-buffered A must stay well under half the limit; leave headroom for
    # P/Q copies, x/out tiles and compute temporaries.
    tile_target = min(12 << 20, vmem_limit // 5)
    tb = max(1, tile_target // a_bytes_per_elem)
    tb = min(tb, B)
    if B >= 2:
        # Keep >= 2 grid steps so the "parallel" axis can use both v7x cores.
        tb = min(tb, -(-B // 2))
    # TODO(synk): for extremely large d (a single (1, d, d) tile > tile_target)
    # the inner (d, d) dims would also need tiling; not implemented here.
    return tb, vmem_limit


def pq_model_bad_forward(P, Q, A, x):
    B, d, _ = A.shape
    TB, vmem_limit = _plan_tiles(B, d, A.dtype.itemsize)
    num_tiles = pl.cdiv(B, TB)

    # Pre-transpose the tiny shared parameter matrices so the kernel uses plain
    # row-major matmuls: x @ Q.T == (Q @ x_b) per row, ax @ P.T == (P @ ax_b).
    Pt = P.T
    Qt = Q.T

    # Present x / out as (B, 1, d): blocks' last two dims are then full-extent,
    # so TB (leading dim, possibly <8, possibly a partial last tile) is legal.
    x3 = x[:, None, :]

    out = pl.pallas_call(
        _pq_kernel,
        out_shape=jax.ShapeDtypeStruct((B, 1, d), jnp.float32),
        grid_spec=pltpu.PrefetchScalarGridSpec(
            num_scalar_prefetch=0,
            grid=(num_tiles,),
            in_specs=[
                pl.BlockSpec((d, d), lambda b: (0, 0)),         # P.T (shared)
                pl.BlockSpec((d, d), lambda b: (0, 0)),         # Q.T (shared)
                pl.BlockSpec((TB, d, d), lambda b: (b, 0, 0)),  # A batch tile
                pl.BlockSpec((TB, 1, d), lambda b: (b, 0, 0)),  # x batch tile
            ],
            out_specs=pl.BlockSpec((TB, 1, d), lambda b: (b, 0, 0)),
        ),
        compiler_params=pltpu.CompilerParams(
            dimension_semantics=("parallel",),
            vmem_limit_bytes=vmem_limit,
        ),
    )(Pt, Qt, A, x3)

    return out[:, 0, :]


if __name__ == "__main__":
    B, d = 2, 32
    key = jax.random.PRNGKey(0)
    k_p, k_a, k_x = jax.random.split(key, 3)

    # Deterministic parameter init mirroring __init__: diag(p), diag(1/p).
    p_values = jax.random.uniform(k_p, (d,), dtype=jnp.float32) * 10.0 + 10.0
    P = jnp.diag(p_values)
    Q = jnp.diag(1.0 / p_values)

    A = jax.random.normal(k_a, (B, d, d), dtype=jnp.float32)
    x = jax.random.normal(k_x, (B, d), dtype=jnp.float32)

    out = jax.block_until_ready(pq_model_bad_forward(P, Q, A, x))

    # Pure-JAX reference in the original (un-reassociated) order.
    mat_ref = jnp.einsum("ij,bjk,kl->bil", P, A, Q)
    out_ref = jnp.einsum("bij,bj->bi", mat_ref, x)
    assert out.shape == (B, d)
    assert jnp.allclose(out, out_ref, rtol=1e-4, atol=1e-4)

    print("KERNEL_OK")
</pallas_src>

<mosaic_0001>
module attributes {stable_mosaic.version = 11 : i64} {
  func.func @_pq_kernel(%arg0: i32, %arg1: memref<32x32xf32, #tpu.memory_space<vmem>>, %arg2: memref<32x32xf32, #tpu.memory_space<vmem>>, %arg3: memref<1x32x32xf32, #tpu.memory_space<vmem>>, %arg4: memref<1x1x32xf32, #tpu.memory_space<vmem>>, %arg5: memref<1x1x32xf32, #tpu.memory_space<vmem>>) attributes {dimension_semantics = [#tpu.dimension_semantics<parallel>], iteration_bounds = array<i64: 2>, scalar_prefetch = 0 : i64, scratch_operands = 0 : i64, tpu.core_type = #tpu.core_type<tc>, window_params = [{pipeline_mode = #tpu.pipeline_mode<synchronous>, transform_indices = @transform_0, window_bounds = array<i64: 32, 32>}, {pipeline_mode = #tpu.pipeline_mode<synchronous>, transform_indices = @transform_1, window_bounds = array<i64: 32, 32>}, {transform_indices = @transform_2, window_bounds = array<i64: 1, 32, 32>}, {transform_indices = @transform_3, window_bounds = array<i64: 1, 1, 32>}, {transform_indices = @transform_4, window_bounds = array<i64: 1, 1, 32>}]} {
    %c0 = arith.constant 0 : index
    %c0_0 = arith.constant 0 : index
    %c0_1 = arith.constant 0 : index
    %0 = vector.load %arg4[%c0, %c0_0, %c0_1] : memref<1x1x32xf32, #tpu.memory_space<vmem>>, vector<1x1x32xf32>
    %1 = vector.shape_cast %0 : vector<1x1x32xf32> to vector<1x32xf32>
    %c0_2 = arith.constant 0 : index
    %c0_3 = arith.constant 0 : index
    %2 = vector.load %arg2[%c0_2, %c0_3] : memref<32x32xf32, #tpu.memory_space<vmem>>, vector<32x32xf32>
    %cst = arith.constant dense<0.000000e+00> : vector<1x32xf32>
    %3 = tpu.matmul %1, %2, %cst {dimension_numbers = #tpu.dot_dimension_numbers<[1], [0], [0], [1], [0, 0, 1, 1], [], []>} : vector<1x32xf32>, vector<32x32xf32>, vector<1x32xf32> -> vector<1x32xf32>
    %c0_4 = arith.constant 0 : index
    %c0_5 = arith.constant 0 : index
    %c0_6 = arith.constant 0 : index
    %4 = vector.load %arg3[%c0_4, %c0_5, %c0_6] : memref<1x32x32xf32, #tpu.memory_space<vmem>>, vector<1x32x32xf32>
    %5 = vector.shape_cast %3 : vector<1x32xf32> to vector<1x1x32xf32>
    %6 = vector.broadcast %5 : vector<1x1x32xf32> to vector<1x32x32xf32>
    %7 = arith.mulf %4, %6 : vector<1x32x32xf32>
    %cst_7 = arith.constant dense<0.000000e+00> : vector<1x32xf32>
    %8 = vector.multi_reduction <add>, %7, %cst_7 [2] : vector<1x32x32xf32> to vector<1x32xf32>
    %c0_8 = arith.constant 0 : index
    %c0_9 = arith.constant 0 : index
    %9 = vector.load %arg1[%c0_8, %c0_9] : memref<32x32xf32, #tpu.memory_space<vmem>>, vector<32x32xf32>
    %cst_10 = arith.constant dense<0.000000e+00> : vector<1x32xf32>
    %10 = tpu.matmul %8, %9, %cst_10 {dimension_numbers = #tpu.dot_dimension_numbers<[1], [0], [0], [1], [0, 0, 1, 1], [], []>} : vector<1x32xf32>, vector<32x32xf32>, vector<1x32xf32> -> vector<1x32xf32>
    %11 = vector.shape_cast %10 : vector<1x32xf32> to vector<1x1x32xf32>
    %c0_11 = arith.constant 0 : index
    %c0_12 = arith.constant 0 : index
    %c0_13 = arith.constant 0 : index
    %12 = vector.load %arg5[%c0_11, %c0_12, %c0_13] : memref<1x1x32xf32, #tpu.memory_space<vmem>>, vector<1x1x32xf32>
    tpu.vector_store %arg5[%c0_11, %c0_12, %c0_13], %11 {strides = array<i32>} : memref<1x1x32xf32, #tpu.memory_space<vmem>>, vector<1x1x32xf32>,
    return
  }
  func.func @transform_0(%arg0: i32) -> (i32, i32) {
    %c0_i32 = arith.constant 0 : i32
    %c0_i32_0 = arith.constant 0 : i32
    %c0_i32_1 = arith.constant 0 : i32
    return %c0_i32, %c0_i32_0 : i32, i32
  }
  func.func @transform_1(%arg0: i32) -> (i32, i32) {
    %c0_i32 = arith.constant 0 : i32
    %c0_i32_0 = arith.constant 0 : i32
    %c0_i32_1 = arith.constant 0 : i32
    return %c0_i32, %c0_i32_0 : i32, i32
  }
  func.func @transform_2(%arg0: i32) -> (i32, i32, i32) {
    %c0_i32 = arith.constant 0 : i32
    %c0_i32_0 = arith.constant 0 : i32
    %c0_i32_1 = arith.constant 0 : i32
    return %arg0, %c0_i32, %c0_i32_0 : i32, i32, i32
  }
  func.func @transform_3(%arg0: i32) -> (i32, i32, i32) {
    %c0_i32 = arith.constant 0 : i32
    %c0_i32_0 = arith.constant 0 : i32
    %c0_i32_1 = arith.constant 0 : i32
    return %arg0, %c0_i32, %c0_i32_0 : i32, i32, i32
  }
  func.func @transform_4(%arg0: i32) -> (i32, i32, i32) {
    %c0_i32 = arith.constant 0 : i32
    %c0_i32_0 = arith.constant 0 : i32
    %c0_i32_1 = arith.constant 0 : i32
    return %arg0, %c0_i32, %c0_i32_0 : i32, i32, i32
  }
}

</mosaic_0001>

<bundles_post_ra>
// kernel: tpu_custom_call.1
= control target key start
LH: loop header
LB: loop body
LE: loop exit
PB: predicated region body
PF: predicated region fallthrough
CT: control target
= control target key end

     0   :  { %9 = vsyncpa [#allocation3], 0  ;;  %s1161_s0 = inlined_call_operand.hbm [shape: f32[32,32], index: 0, kind: input, shape index: {}]   ;;  %s1162_s1 = inlined_call_operand.hbm [shape: f32[32,32], index: 1, kind: input, shape index: {}]   ;;  %s1163_s2 = inlined_call_operand.hbm [shape: f32[2,32,32], index: 2, kind: input, shape index: {}]   ;;  %s1164_s3 = inlined_call_operand.vmem [shape: f32[2,1,32], index: 3, kind: input, shape index: {}]   ;;  %s1165_s4 = inlined_call_operand.hbm [shape: f32[2,1,32], index: 4, kind: output, shape index: {}]  }
   0x1   :  { %10 = vsyncpa [#allocation6], 0 }
   0x2   :  { %11 = vsyncpa [#allocation4], 0 }
   0x3   :  { %13 = vsyncpa [#allocation4 + $0x1], 0  ;;  %s905_s15 = smov 0   ;;  %s907_s16 = smov 0  }
   0x4   :  { %s909_s17 = smov 0   ;;  %s911_s18 = smov 0  }
   0x5 LB: > { %s926_s19 = sadd.s32 4294967295, %s869_s18   ;;  %s575_s20 = sadd.s32 4294967294, %s869_s18   ;;  %s869_s18 = sphi %s911_s18, %s1193_s18   ;;  %s865_s17 = sphi %s909_s17, %s1192_s17   ;;  %s861_s16 = sphi %s907_s16, %s1191_s16   ;;  %s857_s15 = sphi %s905_s15, %s1190_s15  }
   0x6   : > { %s930_s21 = sadd.s32 1, %s869_s18   ;;  %s68_s22 = sadd.s32 1, %s865_s17 }
   0x7   : > { %s65_s23 = ssub.s32 %s869_s18, %s930_s21  ;;  %p75_p0 = scmp.ne.s32.totalorder %s865_s17, %s861_s16 }
   0x8   : > { %p66_p1 = scmp.eq.s32.totalorder %s65_s23, 0  ;;  %p76_p2 = scmp.eq.s32.totalorder %s869_s18, 0 }
   0x9   : > { %p81_p3 = scmp.ne.s32.totalorder %s861_s16, %s857_s15  ;;  %p1166_p4 = scmp.eq.s32.totalorder %s926_s19, 0 }
   0xa   : > { %s942_s24 = scalar_select %p66_p1, %s865_s17, %s68_s22  }
   0xb   : > { %p944_p5 = por %p76_p2, %p75_p0  ;;  %p950_p6 = por %p1166_p4, %p81_p3 }
   0xc   : > { %p131_p7 = scmp.eq.s32.totalorder %s926_s19, 1  ;;  %p137_p8 = scmp.eq.s32.totalorder %s575_s20, 1 }
   0xd   : > { %s1171_s25 = scalar_select %p944_p5, 1, 0 }
   0xe   : > { %s1172_s26 = scalar_select %p950_p6, 1, 0 }
   0xf   : > { %p576_p9 = scmp.ge.s32.totalorder %s869_s18, 1  ;;  %p144_p10 = scmp.lt.s32.totalorder %s869_s18, 3 }
  0x10   : > { %p957_p11 = por %p131_p7, %p75_p0  ;;  %p961_p12 = por %p137_p8, %p81_p3 }
  0x11   : > { %p965_p13 = pnand %p576_p9, %p144_p10  ;;  %s871_s30 = smov [#allocation2]  }
  0x12   : > { %s1173_s27 = scalar_select %p957_p11, 1, 0 }
  0x13   : > { %s1174_s28 = scalar_select %p961_p12, 1, 0 }
  0x14   : > { %s1175_s29 = scalar_select %p965_p13, 1, 0 }
  0x15   : > { %p649_p1 = pneg %p965_p13  ;;  %s156_s5 = sshll.u32 %s871_s30, 4  ;;  %s157_s5 = int_to_ptr.vmem [resolvable:$true] %s156_s5 }
  0x16   : > { %s872_s7 = smov [#allocation5]   ;;  %s709_s11 = scalar_lea.hbm %s1161_s0, 512 }
  0x17   : > { %p973_p2 = pnand %p649_p1, %p1166_p4  ;;  %s169_s8 = sshll.u32 %s872_s7, 4  ;;  %s170_s8 = int_to_ptr.vmem [resolvable:$true] %s169_s8 }
  0x18   : > { %p710_p7 = scmp.ne.s32.totalorder %s1161_s0, %s709_s11  ;;  %p716_p1 = scmp.lt.u32.totalorder %s709_s11, %s1161_s0 }
  0x19   : > { %p711_p8 = pneg %p973_p2 }
  0x1b   : > { %p712_p9 = pnand %p711_p8, %p710_p7 }
  0x1d   : > { %p713_p10 = pneg %p712_p9 }
  0x1f   : > { %p718_p0 = pnand %p716_p1, %p713_p10 }
  0x21   : > { %721 = shalt.err (!%p718_p0)
}
  0x22   : > { %s722_s22 = scalar_lea.vmem %s157_s5, 512  ;;  %p730_p11 = scmp.lt.s32.totalorder %s157_s5, %s157_s5 }
  0x23   : > { %p723_p4 = scmp.ne.s32.totalorder %s157_s5, %s722_s22  ;;  %p731_p6 = scmp.lt.s32.totalorder %s722_s22, %s722_s22 }
  0x25   : > { %p725_p3 = pnand %p723_p4, %p711_p8  ;;  %p732_p13 = por %p731_p6, %p730_p11 }
  0x27   : > { %p726_p12 = pneg %p725_p3 }
  0x29   : > { %p733_p5 = pnand %p732_p13, %p726_p12 }
  0x2b   : > { %736 = shalt.err (!%p733_p5)
}
  0x2c   : > { %s873_s23 = smov 128   ;;  %s874_s30 = smov 8  }
  0x2d   : > { %652 = dma.hbm_to_vmem [thread:$0]  (!%p973_p2), %s1161_s0, 512, %s157_s5, [#allocation3], %s873_s23, %s873_s23, %s874_s30  }
  0x2e   : > { %p1177_p4 = scmp.ne.s32.totalorder %s1171_s25, 0  ;;  %p1178_p0 = scmp.lt.s32.totalorder %s869_s18, 2 }
  0x2f   : > { %s737_s13 = scalar_lea.hbm %s1162_s1, 512 }
  0x30   : > { %p1008_p3 = pnand %p1178_p0, %p1177_p4  ;;  %p738_p5 = scmp.ne.s32.totalorder %s1162_s1, %s737_s13 }
  0x31   : > { %p744_p12 = scmp.lt.u32.totalorder %s737_s13, %s1162_s1 }
  0x32   : > { %s1179_s10 = scalar_select %p1008_p3, 1, 0 }
  0x33   : > { %p740_p6 = pnand %p738_p5, %p711_p8 }
  0x35   : > { %p741_p11 = pneg %p740_p6 }
  0x37   : > { %p746_p13 = pnand %p744_p12, %p741_p11 }
  0x39   : > { %749 = shalt.err (!%p746_p13)
}
  0x3a   : > { %s750_s22 = scalar_lea.vmem %s170_s8, 512  ;;  %p758_p1 = scmp.lt.s32.totalorder %s170_s8, %s170_s8 }
  0x3b   : > { %p751_p7 = scmp.ne.s32.totalorder %s170_s8, %s750_s22  ;;  %p759_p4 = scmp.lt.s32.totalorder %s750_s22, %s750_s22 }
  0x3d   : > { %p753_p9 = pnand %p751_p7, %p711_p8  ;;  %p760_p0 = por %p759_p4, %p758_p1 }
  0x3f   : > { %p754_p10 = pneg %p753_p9 }
  0x41   : > { %p761_p3 = pnand %p760_p0, %p754_p10 }
  0x43   : > { %764 = shalt.err (!%p761_p3)
}
  0x44   : > { %655 = dma.hbm_to_vmem [thread:$0]  (!%p973_p2), %s1162_s1, 512, %s170_s8, [#allocation6], %s873_s23, %s873_s23, %s874_s30  }
  0x45   : > { %s183_s11 = sand.u32 1, %s869_s18   ;;  %s185_s12 = sand.u32 1, %s865_s17  }
  0x46   : > { %s580_s13 = sshll.u32 %s185_s12, 5  ;;  %s592_s14 = sshll.u32 %s869_s18, 9 }
  0x47   : > { %s1041_s6 = scalar_lea.hbm %s1163_s2, %s592_s14  ;;  %s187_s25 = scalar_lea.vmem [#allocation7], %s580_s13 }
  0x48   : > { %s194_s22 = sshll.u32 %s187_s25, 4  ;;  %s1045_s7 = scalar_lea.sflag [#allocation3], %s183_s11  ;;  %s1043_s22 = int_to_ptr.vmem [resolvable:$true] %s194_s22 }
  0x49   : > { %s765_s8 = scalar_lea.hbm %s1041_s6, 512  ;;  %p1180_p8 = scmp.ne.s32.totalorder %s1179_s10, 0 }
  0x4a   : > { %p766_p2 = scmp.ne.s32.totalorder %s1041_s6, %s765_s8  ;;  %s770_s14 = scalar_lea.hbm %s1163_s2, 1024 }
  0x4b   : > { %p767_p3 = pneg %p1180_p8  ;;  %p771_p11 = scmp.lt.u32.totalorder %s1041_s6, %s1163_s2 }
  0x4c   : > { %p772_p12 = scmp.lt.u32.totalorder %s770_s14, %s765_s8  ;;  %p774_p7 = scmp.lt.u32.totalorder %s765_s8, %s1041_s6 }
  0x4d   : > { %p768_p5 = pnand %p767_p3, %p766_p2 }
  0x4e   : > { %p773_p13 = por %p772_p12, %p771_p11 }
  0x4f   : > { %p769_p6 = pneg %p768_p5 }
  0x50   : > { %p775_p9 = por %p774_p7, %p773_p13 }
  0x52   : > { %p776_p10 = pnand %p775_p9, %p769_p6 }
  0x54   : > { %779 = shalt.err (!%p776_p10)
}
  0x55   : > { %s780_s11 = scalar_lea.vmem %s1043_s22, 512  ;;  %s875_s13 = smov [#allocation7]  }
  0x56   : > { %p781_p1 = scmp.ne.s32.totalorder %s1043_s22, %s780_s11  ;;  %s785_s25 = sshll.u32 %s875_s13, 4  ;;  %s786_s25 = int_to_ptr.vmem [resolvable:$false] %s785_s25 }
  0x57   : > { %s787_s9 = scalar_lea.vmem %s786_s25, 1024  ;;  %p788_p2 = scmp.lt.s32.totalorder %s1043_s22, %s786_s25 }
  0x58   : > { %p783_p4 = pnand %p781_p1, %p767_p3  ;;  %p789_p5 = scmp.lt.s32.totalorder %s787_s9, %s780_s11 }
  0x5a   : > { %p784_p0 = pneg %p783_p4  ;;  %p790_p11 = por %p789_p5, %p788_p2 }
  0x5c   : > { %p791_p12 = pnand %p790_p11, %p784_p0 }
  0x5e   : > { %794 = shalt.err (!%p791_p12)
}
  0x5f   : > { %659 = dma.hbm_to_vmem [thread:$0]  (!%p1180_p8), %s1041_s6, 512, %s1043_s22, %s1045_s7, %s873_s23, %s873_s23, %s874_s30  }
  0x60   : > { %p1181_p3 = scmp.ne.s32.totalorder %s1175_s29, 0 }
  0x61   : > { %p1182_p6 = scmp.eq.s32.totalorder (!%p1181_p3), %s926_s19, 0 }
  0x62   : > { %212 = sbr.rel (%p1181_p3) target bundleno = 719 (0x2cf), region = 36 }
  0x69   : > { %840 = dma.done.wait (%p1182_p6), [#allocation3], 512   ;;  %p1183_p13 = pmov %p1182_p6 }
  0x6a   : > { %p1184_p7 = pmov %p1182_p6 }
  0x6b   : > { %842 = vsyncadd (%p1183_p13), [#allocation3], 4294966784 }
  0x6c   : > { %844 = dma.done.wait (%p1184_p7), [#allocation6], 512   ;;  %p1185_p9 = pmov %p1182_p6 }
  0x6d   : > { %s222_s10 = sand.u32 1, %s926_s19   ;;  %s1088_s23 = sand.u32 1, %s861_s16  }
  0x6e   : > { %846 = vsyncadd (%p1185_p9), [#allocation6], 4294966784  ;;  %s586_s29 = sshll.u32 %s1088_s23, 5  ;;  %s223_s30 = scalar_lea.sflag [#allocation3], %s222_s10 }
  0x6f   : > { %s1091_s6 = scalar_lea.vmem [#allocation7], %s586_s29  ;;  %p1186_p8 = scmp.ne.s32.totalorder %s1172_s26, 0 }
  0x71   : > { %848 = dma.done.wait (%p1186_p8), %s223_s30, 512  }
  0x72   : > { %850 = vsyncadd (%p1186_p8), %s223_s30, 4294966784  ;;  %v876_v0 = vmov 0.0|0.0   ;;  %vm877_vm0 = vmmov 0   ;;  %v878_v1 = vmov 0.0   ;;  %p253_p10 = scmp.lt.s32.totalorder %s926_s19, 1  ;;  %v257_v2 = vld [vmem:[#allocation5] sm:$0xff]  ;;  %v339_v9 = vlaneseq }
  0x73   : > { %625 = vmatprep.subr.bf16.mxu0 %v876_v0  ;;  %611 = vmatprep.mubr.msk.f32.mxu0 %vm877_vm0, %v878_v1  ;;  %v258_v3 = vld [vmem:[#allocation5 + $0x8] sm:$0xff]  ;;  %v259_v4 = vld [vmem:[#allocation5 + $0x10] sm:$0xff]  ;;  %v260_v6 = vld [vmem:[#allocation5 + $0x18] sm:$0xff]  ;;  %vm261_vm1 = vcmask 261120   ;;  %vm378_vm2 = vcmask 130112   ;;  %vm385_vm3 = vcmask 195712  }
  0x74   : > { %631 = vmatprep.subr.bf16.mxu1 %v876_v0  ;;  %622 = vmatprep.mubr.msk.f32.mxu1 %vm877_vm0, %v878_v1  ;;  %s254_s22 = scalar_select %p253_p10, %s926_s19, 1  ;;  %v626_v5 = vpack.c.bf16 %v258_v3, %v257_v2  ;;  %v629_v7 = vpack.c.bf16 %v260_v6, %v259_v4  ;;  %v340_v10 = vshrl.u32 %v339_v9, 7  ;;  %v337_v13 = vld [vmem:[%s1091_s6 + $0x10] sm:$0xff]  ;;  %v335_v14 = vld [vmem:[%s1091_s6] sm:$0xff]  ;;  %v338_v17 = vld [vmem:[%s1091_s6 + $0x18] sm:$0xff]  ;;  %v368_v33 = vand.u32 127, %v339_v9 }
  0x75   : > { %v336_v18 = vld [vmem:[%s1091_s6 + $0x8] sm:$0xff]  ;;  %v359_v27 = vld [vmem:[#allocation2] sm:$0xff]  ;;  %v361_v30 = vld [vmem:[#allocation2 + $0x10] sm:$0xff]  ;;  %vm392_vm4 = vcmask 261312   ;;  %s589_s12 = sshll.u32 %s926_s19, 4  ;;  %s252_s14 = scalar_lea.vmem [#allocation8], %s1088_s23 }
  0x76   : > { %627 = vmatpush3.bf16.msra.mxu0 %v626_v5  ;;  %s255_s8 = scalar_lea.vmem %s1164_s3, %s254_s22  ;;  %v341_v11 = vsub.s32 0, %v340_v10  ;;  %v360_v28 = vld [vmem:[#allocation2 + $0x8] sm:$0xff]  ;;  %v362_v31 = vld [vmem:[#allocation2 + $0x18] sm:$0xff]  ;;  %v373_v34 = vadd.s32 4294967288, %v368_v33  ;;  %v380_v35 = vadd.s32 4294967280, %v368_v33  ;;  %v387_v36 = vadd.s32 4294967272, %v368_v33  ;;  %s1117_s13 = scalar_lea.hbm %s1165_s4, %s589_s12 }
  0x77   : > { %628 = vmatprep.subr.bf16.mxu0 %v876_v0  ;;  %v256_v8 = vld [vmem:[%s255_s8] sm:$0x1]  ;;  %v632_v29 = vpack.c.bf16 %v360_v28, %v359_v27  ;;  %v635_v32 = vpack.c.bf16 %v362_v31, %v361_v30  ;;  %v371_v39 = vsub.s32 %v368_v33, %v340_v10  ;;  %s481_s20 = sshll.u32 %s252_s14, 4  ;;  %vm466_vm5 = vcmask 253952   ;;  %s469_s25 = scalar_lea.sflag [#allocation4], %s1088_s23  ;;  %s1119_s20 = int_to_ptr.vmem [resolvable:$true] %s481_s20 }
  0x78   : > { %v376_v40 = vsub.s32 %v373_v34, %v340_v10  ;;  %v383_v41 = vsub.s32 %v380_v35, %v340_v10  ;;  %v390_v42 = vsub.s32 %v387_v36, %v340_v10  ;;  %s795_s9 = scalar_lea.vmem %s1119_s20, 16  ;;  %p1187_p4 = scmp.ne.s32.totalorder %s1173_s27, 0 }
  0x79   : > { %633 = vmatpush3.bf16.msra.mxu1 %v632_v29  ;;  %p796_p1 = scmp.ne.s32.totalorder %s1119_s20, %s795_s9  ;;  %s879_s19 = smov [#allocation8]  }
  0x7a   : > { %630 = vmatpush3.bf16.msra.mxu0 %v629_v7  ;;  %634 = vmatprep.subr.bf16.mxu1 %v876_v0  ;;  %s799_s10 = sshll.u32 %s879_s19, 4  ;;  %s800_s10 = int_to_ptr.vmem [resolvable:$false] %s799_s10 }
  0x7b   : > { %p797_p0 = pnand %p796_p1, %p1187_p4  ;;  %s801_s29 = scalar_lea.vmem %s800_s10, 32 }
  0x7c   : > { %p802_p5 = scmp.lt.s32.totalorder %s1119_s20, %s800_s10  ;;  %p803_p11 = scmp.lt.s32.totalorder %s801_s29, %s795_s9 }
  0x7d   : > { %612 = vmatmul.mubr.msk.f32.vlgmr.msra.gmra.mrb[0].mxu0 %vm261_vm1, %v256_v8  ;;  %636 = vmatpush3.bf16.msra.mxu1 %v635_v32  ;;  %p798_p2 = pneg %p797_p0 }
  0x7e   : > { %p804_p12 = por %p803_p11, %p802_p5 }
  0x80   : > { %p805_p3 = pnand %p804_p12, %p798_p2 }
 0x150   : > { %v331_v12 = vpop.f32.mrb[0].mxu0 }
 0x151   : > { %v342_v15 = vrot.slane %v331_v12, %v341_v11  ;;  %v613_v16 = vpop.f32.mrb[1].mxu0 }
 0x153   : > { %v345_v19 = vmul.f32 %v342_v15, %v337_v13  ;;  %v343_v20 = vmul.f32 %v342_v15, %v335_v14  ;;  %v346_v23 = vmul.f32 %v342_v15, %v338_v17  ;;  %v344_v24 = vmul.f32 %v342_v15, %v336_v18 }
 0x155   : > { %v353_v21 = vsel %vm261_vm1, %v345_v19, 0.0  ;;  %v347_v22 = vsel %vm261_vm1, %v343_v20, 0.0  ;;  %v356_v25 = vsel %vm261_vm1, %v346_v23, 0.0  ;;  %v350_v26 = vsel %vm261_vm1, %v344_v24, 0.0 }
 0x156   : > { %354 = vadd.xlane.f32.xlu1 %v353_v21  ;;  %348 = vadd.xlane.f32.xlu0 %v347_v22 }
 0x15a   : > { %357 = vadd.xlane.f32.xlu1 %v356_v25  ;;  %351 = vadd.xlane.f32.xlu0 %v350_v26 }
 0x1e3   : > { %v355_v37 = vpop.xlane.xlu1 %354  ;;  %v349_v38 = vpop.xlane.xlu0 %348 }
 0x1e4   : > { %v372_v45 = vrot.slane %v349_v38, %v371_v39  ;;  %v384_v47 = vrot.slane %v355_v37, %v383_v41 }
 0x1e7   : > { %v358_v43 = vpop.xlane.xlu1 %357  ;;  %v352_v44 = vpop.xlane.xlu0 %351 }
 0x1e8   : > { %v377_v46 = vrot.slane %v352_v44, %v376_v40  ;;  %v391_v48 = vrot.slane %v358_v43, %v390_v42 }
 0x1ea   : > { %v379_v49 = vsel %vm378_vm2, %v377_v46, %v372_v45 }
 0x1eb   : > { %v386_v50 = vsel %vm385_vm3, %v384_v47, %v379_v49 }
 0x1ec   : > { %v393_v51 = vsel %vm392_vm4, %v391_v48, %v386_v50 }
 0x1ed   : > { %623 = vmatmul.mubr.msk.f32.vlgmr.msra.gmra.mrb[0].mxu1 %vm261_vm1, %v393_v51 }
 0x2c0   : > { %v462_v52 = vpop.f32.mrb[0].mxu1 }
 0x2c1   : > { %467 = vst.msk [vmem:[%s252_s14] sm:$0x1] %vm466_vm5, %v462_v52  ;;  %v624_v53 = vpop.f32.mrb[1].mxu1 }
 0x2c2   : > { %808 = shalt.err (!%p805_p3)
}
 0x2c3   : > { %s809_s23 = scalar_lea.hbm %s1117_s13, 16  ;;  %s813_s22 = scalar_lea.hbm %s1165_s4, 32 }
 0x2c4   : > { %p810_p6 = scmp.ne.s32.totalorder %s1117_s13, %s809_s23  ;;  %p814_p9 = scmp.lt.u32.totalorder %s1117_s13, %s1165_s4 }
 0x2c5   : > { %p815_p8 = scmp.lt.u32.totalorder %s813_s22, %s809_s23  ;;  %p817_p1 = scmp.lt.u32.totalorder %s809_s23, %s1117_s13 }
 0x2c6   : > { %p811_p13 = pnand %p810_p6, %p1187_p4 }
 0x2c7   : > { %p816_p10 = por %p815_p8, %p814_p9 }
 0x2c8   : > { %p812_p7 = pneg %p811_p13 }
 0x2c9   : > { %p818_p0 = por %p817_p1, %p816_p10 }
 0x2cb   : > { %p819_p2 = pnand %p818_p0, %p812_p7 }
 0x2cd   : > { %822 = shalt.err (!%p819_p2)
}
 0x2ce   : > { %647 = dma.vmem_to_hbm [thread:$0]  (%p1187_p4), %s1119_s20, 16, %s1117_s13, %s469_s25  }
 0x2cf PF: > { %s493_s8 = sand.u32 1, %s857_s15   ;;  %p1188_p5 = scmp.ne.s32.totalorder %s1174_s28, 0 }
 0x2d0   : > { %p1189_p11 = scmp.ge.s32.totalorder %s869_s18, 2  ;;  %s494_s12 = scalar_lea.sflag [#allocation4], %s493_s8 }
 0x2d2   : > { %p661_p12 = pnand %p1189_p11, %p1188_p5 }
 0x2d4   : > { %852 = dma.done.wait (!%p661_p12), %s494_s12, 16  }
 0x2d5   : > { %854 = vsyncadd (!%p661_p12), %s494_s12, 4294967280  ;;  %p16_p3 = scmp.ge.s32.totalorder %s930_s21, 4   ;;  %s1190_s15 = smov %s861_s16 }
 0x2d6   : > { %s1191_s16 = smov %s865_s17  ;;  %s1192_s17 = smov %s942_s24 }
 0x2d7   : > { %s1193_s18 = smov %s930_s21  ;;  %18 = sbr.rel (!%p16_p3) target bundleno = 5 (0x5), region = 91 }
 0x2de   :  { %498 = vsyncpa [#allocation3], 1 }
 0x2df   :  { %500 = vsyncpa [#allocation3 + $0x1], 1 }
 0x2e0   :  { %501 = vsyncpa [#allocation6], 1 }
 0x2e1   :  { %502 = vsyncpa [#allocation4], 1 }
 0x2e2   :  { %504 = vsyncpa [#allocation4 + $0x1], 1 }

</bundles_post_ra>
